<compile_context>
chip_gen: v7x
topology: tpu7x:2x2x1
jax: 0.10.0
libtpu: 0.0.40
codegen_flags: <defaults>
</compile_context>

<pallas_src>
import jax
import jax.numpy as jnp
from jax.experimental import pallas as pl
from jax.experimental.pallas import tpu as pltpu


def _film_kernel(g_ref, b_ref, x_ref, o_ref):
    # g_ref/b_ref: (R_TILE, 1) f32 per-row gain/bias (constant across the T axis,
    #              so they stay VMEM-resident).
    # x_ref/o_ref: (R_TILE, T_TILE) streaming tiles.
    x = x_ref[...].astype(jnp.float32)
    o_ref[...] = (x * g_ref[...] + b_ref[...]).astype(o_ref.dtype)


def _default_tile_budget():
    """Per-generation target bytes for ONE x tile (4x double-buffered in+out total)."""
    try:
        kind = jax.devices()[0].device_kind.lower()
    except Exception:
        return 4 << 20
    if "v7" in kind:
        return 7 << 20       # ~28 MiB pipelined, inside 64 MiB physical VMEM
    if "v5" in kind:
        return 3 << 20       # ~12 MiB pipelined, inside 16 MiB default scoped VMEM bump
    return 4 << 20           # v6e & default: ~16 MiB pipelined


def _pick_tiles(R, T, itemsize, tile_budget_bytes):
    """(R_TILE, T_TILE): R_TILE multiple of 8 (or R), T_TILE multiple of 128 (or T),
    sized from the VMEM budget, then capped so the grid has >= 2 total steps."""
    # Lane-dense T tile: prefer full T (widest unmasked vst) if it fits the budget
    # with at least 8 rows.
    if T <= 128:
        t_tile = T
    else:
        max_t = max(tile_budget_bytes // (8 * itemsize), 128)
        t_tile = min(T, (max_t // 128) * 128)
        if t_tile >= T:
            t_tile = T
    # Row tile from remaining budget.
    if R <= 8:
        r_tile = R
    else:
        max_r = max(tile_budget_bytes // (t_tile * itemsize), 8)
        r_tile = min(R, (max_r // 8) * 8)
        if r_tile >= R:
            r_tile = R
    # Keep >= 2 grid steps so megacore (v7x) has work to shard.
    if pl.cdiv(R, r_tile) * pl.cdiv(T, t_tile) < 2:
        if T >= 256:
            t_tile = max(128, ((pl.cdiv(T, 2) + 127) // 128) * 128)
        elif R >= 16:
            r_tile = max(8, ((pl.cdiv(R, 2) + 7) // 8) * 8)
    return r_tile, t_tile


def film(x, condition, gain_w, gain_b, bias_w, bias_b, *, tile_budget_bytes=None):
    """x: (B, C, T); condition: (B, Dc); *_w are PyTorch Linear weights (C, Dc)."""
    B, C, T = x.shape
    R = B * C
    itemsize = x.dtype.itemsize

    if tile_budget_bytes is None:
        tile_budget_bytes = _default_tile_budget()

    # Wrapper-side precompute: one fused (B,Dc)x(Dc,2C) matmul in f32 (plain XLA).
    w_fused = jnp.concatenate([gain_w.T, bias_w.T], axis=1).astype(jnp.float32)  # (Dc, 2C)
    b_fused = jnp.concatenate([gain_b, bias_b]).astype(jnp.float32)              # (2C,)
    gb = condition.astype(jnp.float32) @ w_fused + b_fused                       # (B, 2C)
    gain = gb[:, :C].reshape(R, 1)                                               # (B*C, 1)
    bias = gb[:, C:].reshape(R, 1)                                               # (B*C, 1)

    # Zero-copy flatten of x to (B*C, T) for 2-D streaming tiles.
    x2 = x.reshape(R, T)

    r_tile, t_tile = _pick_tiles(R, T, itemsize, tile_budget_bytes)
    grid = (pl.cdiv(R, r_tile), pl.cdiv(T, t_tile))

    # VMEM budget: 2x double-buffered (in + out) x tiles + tiny gain/bias blocks.
    tile_bytes = r_tile * t_tile * itemsize
    small_bytes = 2 * 2 * r_tile * 4                       # gain+bias blocks, buffered
    vmem_limit = int(min(max(4 * tile_bytes + small_bytes + (2 << 20), 8 << 20),
                         48 << 20))                        # v7x headroom

    cost = pl.CostEstimate(
        flops=2 * R * T,
        transcendentals=0,
        bytes_accessed=2 * R * T * itemsize + 2 * R * 4,
    )

    out2 = pl.pallas_call(
        _film_kernel,
        out_shape=jax.ShapeDtypeStruct((R, T), x.dtype),
        grid=grid,
        in_specs=[
            pl.BlockSpec((r_tile, 1), lambda r, t: (r, 0)),        # gain rows (f32)
            pl.BlockSpec((r_tile, 1), lambda r, t: (r, 0)),        # bias rows (f32)
            pl.BlockSpec((r_tile, t_tile), lambda r, t: (r, t)),   # x tile
        ],
        out_specs=pl.BlockSpec((r_tile, t_tile), lambda r, t: (r, t)),
        compiler_params=pltpu.CompilerParams(
            dimension_semantics=("parallel", "parallel"),
            vmem_limit_bytes=vmem_limit,
        ),
        cost_estimate=cost,
    )(gain, bias, x2)

    return out2.reshape(B, C, T)


def xavier_uniform(key, out_features, in_features, dtype=jnp.float32):
    bound = (6.0 / (in_features + out_features)) ** 0.5
    return jax.random.uniform(
        key, (out_features, in_features), dtype=dtype, minval=-bound, maxval=bound
    )


if __name__ == "__main__":
    # batch, in_channels, time, condition_channels (small test shapes)
    B, C, T, Dc = 2, 32, 512, 16

    key = jax.random.PRNGKey(0)
    k_x, k_c, k_wg, k_wb = jax.random.split(key, 4)

    x = jax.random.normal(k_x, (B, C, T), dtype=jnp.float32)
    condition = jax.random.normal(k_c, (B, Dc), dtype=jnp.float32)

    # Deterministic parameter init matching the module's __init__:
    #   gain: xavier_uniform weight, bias = 1;  bias: xavier_uniform weight, bias = 0
    gain_w = xavier_uniform(k_wg, C, Dc)
    gain_b = jnp.ones((C,), dtype=jnp.float32)
    bias_w = xavier_uniform(k_wb, C, Dc)
    bias_b = jnp.zeros((C,), dtype=jnp.float32)

    out = film(x, condition, gain_w, gain_b, bias_w, bias_b)
    out = jax.block_until_ready(out)

    # Pure-JAX reference check.
    gain_ref = condition @ gain_w.T + gain_b            # (B, C)
    bias_ref = condition @ bias_w.T + bias_b            # (B, C)
    ref = x * gain_ref[:, :, None] + bias_ref[:, :, None]
    assert jnp.allclose(out, ref, atol=1e-5, rtol=1e-5), "mismatch vs reference"

    print("KERNEL_OK")
</pallas_src>

<mosaic_0001>
module attributes {stable_mosaic.version = 11 : i64} {
  func.func @_film_kernel(%arg0: i32, %arg1: i32, %arg2: memref<64x1xf32, #tpu.memory_space<vmem>>, %arg3: memref<64x1xf32, #tpu.memory_space<vmem>>, %arg4: memref<64x256xf32, #tpu.memory_space<vmem>>, %arg5: memref<64x256xf32, #tpu.memory_space<vmem>>) attributes {dimension_semantics = [#tpu.dimension_semantics<parallel>, #tpu.dimension_semantics<parallel>], iteration_bounds = array<i64: 1, 2>, scalar_prefetch = 0 : i64, scratch_operands = 0 : i64, tpu.core_type = #tpu.core_type<tc>, window_params = [{transform_indices = @transform_0, window_bounds = array<i64: 64, 1>}, {transform_indices = @transform_1, window_bounds = array<i64: 64, 1>}, {transform_indices = @transform_2, window_bounds = array<i64: 64, 256>}, {transform_indices = @transform_3, window_bounds = array<i64: 64, 256>}]} {
    %c0 = arith.constant 0 : index
    %c0_0 = arith.constant 0 : index
    %0 = vector.load %arg4[%c0, %c0_0] : memref<64x256xf32, #tpu.memory_space<vmem>>, vector<64x256xf32>
    %c0_1 = arith.constant 0 : index
    %c0_2 = arith.constant 0 : index
    %1 = vector.load %arg2[%c0_1, %c0_2] : memref<64x1xf32, #tpu.memory_space<vmem>>, vector<64x1xf32>
    %2 = vector.broadcast %1 : vector<64x1xf32> to vector<64x256xf32>
    %3 = arith.mulf %0, %2 : vector<64x256xf32>
    %c0_3 = arith.constant 0 : index
    %c0_4 = arith.constant 0 : index
    %4 = vector.load %arg3[%c0_3, %c0_4] : memref<64x1xf32, #tpu.memory_space<vmem>>, vector<64x1xf32>
    %5 = vector.broadcast %4 : vector<64x1xf32> to vector<64x256xf32>
    %6 = arith.addf %3, %5 : vector<64x256xf32>
    %c0_5 = arith.constant 0 : index
    %c0_6 = arith.constant 0 : index
    %7 = vector.load %arg5[%c0_5, %c0_6] : memref<64x256xf32, #tpu.memory_space<vmem>>, vector<64x256xf32>
    tpu.vector_store %arg5[%c0_5, %c0_6], %6 {strides = array<i32>} : memref<64x256xf32, #tpu.memory_space<vmem>>, vector<64x256xf32>,
    return
  }
  func.func @transform_0(%arg0: i32, %arg1: i32) -> (i32, i32) {
    %c0_i32 = arith.constant 0 : i32
    %c0_i32_0 = arith.constant 0 : i32
    return %arg0, %c0_i32 : i32, i32
  }
  func.func @transform_1(%arg0: i32, %arg1: i32) -> (i32, i32) {
    %c0_i32 = arith.constant 0 : i32
    %c0_i32_0 = arith.constant 0 : i32
    return %arg0, %c0_i32 : i32, i32
  }
  func.func @transform_2(%arg0: i32, %arg1: i32) -> (i32, i32) {
    %c0_i32 = arith.constant 0 : i32
    return %arg0, %arg1 : i32, i32
  }
  func.func @transform_3(%arg0: i32, %arg1: i32) -> (i32, i32) {
    %c0_i32 = arith.constant 0 : i32
    return %arg0, %arg1 : i32, i32
  }
}

</mosaic_0001>

<bundles_post_ra>
// kernel: tpu_custom_call.1
= control target key start
LH: loop header
LB: loop body
LE: loop exit
PB: predicated region body
PF: predicated region fallthrough
CT: control target
= control target key end

     0   :  { %8 = vsyncpa [#allocation3], 0  ;;  %s1045_s0 = inlined_call_operand.vmem [shape: f32[64,1], index: 0, kind: input, shape index: {}]   ;;  %s1046_s1 = inlined_call_operand.vmem [shape: f32[64,1], index: 1, kind: input, shape index: {}]   ;;  %s1047_s2 = inlined_call_operand.hbm [shape: f32[64,512], index: 2, kind: input, shape index: {}]   ;;  %s1048_s3 = inlined_call_operand.hbm [shape: f32[64,512], index: 3, kind: output, shape index: {}]  }
   0x1   :  { %10 = vsyncpa [#allocation3 + $0x1], 0 }
   0x2   :  { %11 = vsyncpa [#allocation4], 0 }
   0x3   :  { %13 = vsyncpa [#allocation4 + $0x1], 0  ;;  %s783_s12 = smov 0   ;;  %s785_s13 = smov 0  }
   0x4   :  { %s787_s14 = smov 0   ;;  %s789_s15 = smov 0  }
   0x5   :  { %s791_s16 = smov 0   ;;  %s793_s17 = smov 0  }
   0x6 LB: > { %s550_s18 = sadd.s32 4294967295, %s752_s17   ;;  %s551_s19 = sadd.s32 4294967294, %s752_s17   ;;  %s752_s17 = sphi %s793_s17, %s19_s17   ;;  %s748_s16 = sphi %s791_s16, %s1062_s16   ;;  %s744_s15 = sphi %s789_s15, %s1061_s15   ;;  %s740_s14 = sphi %s787_s14, %s1060_s14   ;;  %s736_s13 = sphi %s785_s13, %s1059_s13   ;;  %s732_s12 = sphi %s783_s12, %s1058_s12  }
   0x7   : > { %s28_s20 = sadd.s32 1, %s748_s16  ;;  %s92_s21 = sadd.s32 1, %s740_s14 }
   0x8   : > { %p29_p0 = scmp.ge.s32.totalorder %s28_s20, 2  ;;  %p99_p1 = scmp.ne.s32.totalorder %s740_s14, %s736_s13 }
   0x9   : > { %p100_p2 = scmp.eq.s32.totalorder %s752_s17, 0  ;;  %p105_p3 = scmp.ne.s32.totalorder %s736_s13, %s732_s12 }
   0xa   : > { %s1064_s20 = smov (%p29_p0, %s28_s20), 0  ;;  %p106_p5 = scmp.eq.s32.totalorder %s550_s18, 0 }
   0xb   : > { %p824_p4 = por %p100_p2, %p99_p1  ;;  %s88_s23 = ssub.s32 %s748_s16, %s1064_s20 }
   0xc   : > { %p131_p6 = scmp.eq.s32.totalorder %s550_s18, 1  ;;  %p90_p7 = scmp.eq.s32.totalorder %s88_s23, 0 }
   0xd   : > { %p830_p8 = por %p106_p5, %p105_p3  ;;  %p137_p10 = scmp.eq.s32.totalorder %s551_s19, 1 }
   0xe   : > { %p834_p9 = por %p131_p6, %p99_p1  ;;  %p581_p13 = scmp.lt.s32.totalorder %s752_s17, 2 }
   0xf   : > { %s839_s26 = scalar_select %p90_p7, %s740_s14, %s92_s21  }
  0x10   : > { %s1052_s25 = scalar_select %p834_p9, 1, 0 }
  0x11   : > { %p841_p11 = por %p137_p10, %p105_p3  ;;  %s175_s28 = sand.u32 1, %s740_s14  }
  0x12   : > { %s556_s29 = sshll.u32 %s175_s28, 7  ;;  %s567_s30 = sshll.u32 %s748_s16, 8 }
  0x13   : > { %s1053_s27 = scalar_select %p841_p11, 1, 0 }
  0x14   : > { %s852_s6 = scalar_lea.hbm %s1047_s2, %s567_s30  ;;  %s179_s7 = scalar_lea.vmem [#allocation2], %s556_s29 }
  0x15   : > { %s189_s8 = sshll.u32 %s179_s7, 4  ;;  %p858_p0 = pnand %p581_p13, %p824_p4  ;;  %s854_s8 = int_to_ptr.vmem [resolvable:$true] %s189_s8 }
  0x16   : > { %s862_s10 = scalar_lea.sflag [#allocation3], %s175_s28  ;;  %s640_s11 = scalar_lea.hbm %s852_s6, 2048 }
  0x17   : > { %p641_p1 = scmp.ne.s32.totalorder %s852_s6, %s640_s11  ;;  %p642_p2 = pneg %p858_p0 }
  0x18   : > { %s645_s21 = scalar_lea.hbm %s1047_s2, 4096  ;;  %p646_p4 = scmp.lt.u32.totalorder %s852_s6, %s1047_s2 }
  0x19   : > { %p643_p3 = pnand %p642_p2, %p641_p1  ;;  %p647_p6 = scmp.lt.u32.totalorder %s645_s21, %s640_s11 }
  0x1a   : > { %p649_p10 = scmp.lt.u32.totalorder %s640_s11, %s852_s6 }
  0x1b   : > { %p644_p5 = pneg %p643_p3  ;;  %p648_p7 = por %p647_p6, %p646_p4 }
  0x1d   : > { %p650_p13 = por %p649_p10, %p648_p7 }
  0x1f   : > { %p651_p12 = pnand %p650_p13, %p644_p5 }
  0x21   : > { %654 = shalt.err (!%p651_p12)
}
  0x22   : > { %s655_s28 = scalar_lea.vmem %s854_s8, 2048  ;;  %s754_s29 = smov [#allocation2]  }
  0x23   : > { %p656_p1 = scmp.ne.s32.totalorder %s854_s8, %s655_s28  ;;  %s660_s30 = sshll.u32 %s754_s29, 4  ;;  %s661_s30 = int_to_ptr.vmem [resolvable:$false] %s660_s30 }
  0x24   : > { %s662_s4 = scalar_lea.vmem %s661_s30, 4096  ;;  %p663_p9 = scmp.lt.s32.totalorder %s854_s8, %s661_s30 }
  0x25   : > { %p658_p3 = pnand %p656_p1, %p642_p2  ;;  %p664_p4 = scmp.lt.s32.totalorder %s662_s4, %s655_s28 }
  0x27   : > { %p659_p11 = pneg %p658_p3  ;;  %p665_p6 = por %p664_p4, %p663_p9 }
  0x29   : > { %p666_p7 = pnand %p665_p6, %p659_p11 }
  0x2b   : > { %669 = shalt.err (!%p666_p7)
}
  0x2c   : > { %s755_s5 = smov 512   ;;  %s756_s7 = smov 256  }
  0x2d   : > { %s757_s11 = smov 16   ;;  %p559_p12 = scmp.ge.s32.totalorder %s752_s17, 1 }
  0x2e   : > { %576 = dma.hbm_to_vmem [thread:$0]  (!%p858_p0), %s852_s6, 2048, %s854_s8, %s862_s10, %s755_s5, %s756_s7, %s757_s11  }
  0x2f   : > { %p197_p2 = scmp.lt.s32.totalorder %s752_s17, 3 }
  0x31   : > { %p198_p5 = pnand %p559_p12, %p197_p2 }
  0x32   : > { %s893_s18 = sand.u32 (!%p198_p5), 1, %s736_s13  }
  0x33   : > { %201 = sbr.rel (%p198_p5) target bundleno = 236 (0xec), region = 32  ;;  %s560_s19 = sshll.u32 (!%p198_p5), %s893_s18, 7 }
  0x34   : > { %s204_s21 = scalar_lea.sflag (!%p198_p5), [#allocation3], %s893_s18  ;;  %s899_s22 = scalar_lea.vmem (!%p198_p5), [#allocation2], %s560_s19 }
  0x3a   : > { %723 = dma.done.wait (%p830_p8), %s204_s21, 2048  }
  0x3b   : > { %725 = vsyncadd (%p830_p8), %s204_s21, 4294965248  ;;  %v758_v0 = vmov 0   ;;  %v274_v1 = vld [vmem:[%s1045_s0 + $0x10] sm:$0xff]  ;;  %v272_v2 = vld [vmem:[%s1045_s0] sm:$0xff]  ;;  %s964_s23 = scalar_lea.vmem [#allocation5], %s560_s19  ;;  %s568_s19 = sshll.u32 %s744_s15, 8 }
  0x3c   : > { %639 = vset.pattern.permute.xlu1 %v758_v0  ;;  %638 = vset.pattern.permute.xlu0 %v758_v0  ;;  %v275_v3 = vld [vmem:[%s1045_s0 + $0x18] sm:$0xff]  ;;  %v273_v4 = vld [vmem:[%s1045_s0 + $0x8] sm:$0xff]  ;;  %v276_v6 = vld [vmem:[%s1045_s0 + $0x20] sm:$0xff]  ;;  %s433_s28 = sshll.u32 %s964_s23, 4  ;;  %s990_s29 = scalar_lea.hbm %s1048_s3, %s568_s19  ;;  %s992_s28 = int_to_ptr.vmem [resolvable:$true] %s433_s28 }
  0x3d   : > { %292 = vperm.xlu1 %639, %v274_v1   ;;  %282 = vperm.xlu0 %638, %v272_v2   ;;  %v277_v5 = vld [vmem:[%s1045_s0 + $0x28] sm:$0xff]  ;;  %v279_v7 = vld [vmem:[%s1045_s0 + $0x38] sm:$0xff]  ;;  %v278_v8 = vld [vmem:[%s1045_s0 + $0x30] sm:$0xff]  ;;  %s417_s24 = scalar_lea.sflag [#allocation4], %s893_s18  ;;  %s670_s30 = scalar_lea.vmem %s992_s28, 2048 }
  0x3e   : > { %v337_v9 = vld [vmem:[%s1046_s1 + $0x8] sm:$0xff]  ;;  %v336_v10 = vld [vmem:[%s1046_s1] sm:$0xff]  ;;  %v339_v11 = vld [vmem:[%s1046_s1 + $0x18] sm:$0xff]  ;;  %p671_p8 = scmp.ne.s32.totalorder %s992_s28, %s670_s30  ;;  %p1055_p9 = scmp.ne.s32.totalorder %s1052_s25, 0 }
  0x3f   : > { %v338_v12 = vld [vmem:[%s1046_s1 + $0x10] sm:$0xff]  ;;  %v341_v13 = vld [vmem:[%s1046_s1 + $0x28] sm:$0xff]  ;;  %v340_v14 = vld [vmem:[%s1046_s1 + $0x20] sm:$0xff]  ;;  %s759_s4 = smov [#allocation5]  }
  0x40   : > { %v343_v15 = vld [vmem:[%s1046_s1 + $0x38] sm:$0xff]  ;;  %v342_v16 = vld [vmem:[%s1046_s1 + $0x30] sm:$0xff]  ;;  %v256_v23 = vld [vmem:[%s899_s22] sm:$0xff]  ;;  %p672_p11 = pnand %p671_p8, %p1055_p9  ;;  %s674_s5 = sshll.u32 %s759_s4, 4  ;;  %s675_s5 = int_to_ptr.vmem [resolvable:$false] %s674_s5 }
  0x41   : > { %297 = vperm.xlu1 %639, %v275_v3   ;;  %287 = vperm.xlu0 %638, %v273_v4   ;;  %v257_v24 = vld [vmem:[%s899_s22 + $0x8] sm:$0xff]  ;;  %v258_v25 = vld [vmem:[%s899_s22 + $0x10] sm:$0xff]  ;;  %v259_v26 = vld [vmem:[%s899_s22 + $0x18] sm:$0xff]  ;;  %s676_s7 = scalar_lea.vmem %s675_s5, 4096  ;;  %p677_p10 = scmp.lt.s32.totalorder %s992_s28, %s675_s5 }
  0x42   : > { %v260_v29 = vld [vmem:[%s899_s22 + $0x20] sm:$0xff]  ;;  %v261_v34 = vld [vmem:[%s899_s22 + $0x28] sm:$0xff]  ;;  %v262_v35 = vld [vmem:[%s899_s22 + $0x30] sm:$0xff]  ;;  %p673_p0 = pneg %p672_p11  ;;  %p678_p13 = scmp.lt.s32.totalorder %s676_s7, %s670_s30 }
  0x43   : > { %v263_v36 = vld [vmem:[%s899_s22 + $0x38] sm:$0xff]  ;;  %v266_v47 = vld [vmem:[%s899_s22 + $0x50] sm:$0xff]  ;;  %v264_v49 = vld [vmem:[%s899_s22 + $0x40] sm:$0xff] }
  0x44   : > { %v267_v48 = vld [vmem:[%s899_s22 + $0x58] sm:$0xff]  ;;  %v265_v50 = vld [vmem:[%s899_s22 + $0x48] sm:$0xff]  ;;  %v270_v61 = vld [vmem:[%s899_s22 + $0x70] sm:$0xff]  ;;  %p679_p1 = por %p678_p13, %p677_p10 }
  0x45   : > { %307 = vperm.xlu1 %639, %v277_v5   ;;  %302 = vperm.xlu0 %638, %v276_v6   ;;  %v271_v62 = vld [vmem:[%s899_s22 + $0x78] sm:$0xff]  ;;  %v268_v63 = vld [vmem:[%s899_s22 + $0x60] sm:$0xff]  ;;  %v269_v0 = vld [vmem:[%s899_s22 + $0x68] sm:$0xff] }
  0x46   : > { %p680_p3 = pnand %p679_p1, %p673_p0 }
  0x49   : > { %317 = vperm.xlu1 %639, %v279_v7   ;;  %312 = vperm.xlu0 %638, %v278_v8  }
  0x4d   : > { %351 = vperm.xlu1 %639, %v337_v9   ;;  %346 = vperm.xlu0 %638, %v336_v10  }
  0x51   : > { %361 = vperm.xlu1 %639, %v339_v11   ;;  %356 = vperm.xlu0 %638, %v338_v12  }
  0x55   : > { %371 = vperm.xlu1 %639, %v341_v13   ;;  %366 = vperm.xlu0 %638, %v340_v14  }
  0x59   : > { %381 = vperm.xlu1 %639, %v343_v15   ;;  %376 = vperm.xlu0 %638, %v342_v16  }
  0xbc   : > { %v293_v17 = vpop.permute.xlu1 %292  ;;  %v283_v18 = vpop.permute.xlu0 %282 }
  0xbd   : > { %v320_v30 = vmul.f32 %v283_v18, %v256_v23  ;;  %v321_v31 = vmul.f32 %v283_v18, %v257_v24  ;;  %v324_v43 = vmul.f32 %v293_v17, %v260_v29  ;;  %v325_v44 = vmul.f32 %v293_v17, %v261_v34 }
  0xc0   : > { %v298_v19 = vpop.permute.xlu1 %297  ;;  %v288_v20 = vpop.permute.xlu0 %287 }
  0xc1   : > { %v322_v32 = vmul.f32 %v288_v20, %v258_v25  ;;  %v323_v33 = vmul.f32 %v288_v20, %v259_v26  ;;  %v326_v45 = vmul.f32 %v298_v19, %v262_v35  ;;  %v327_v46 = vmul.f32 %v298_v19, %v263_v36 }
  0xc4   : > { %v308_v21 = vpop.permute.xlu1 %307  ;;  %v303_v22 = vpop.permute.xlu0 %302 }
  0xc5   : > { %v330_v57 = vmul.f32 %v308_v21, %v266_v47  ;;  %v331_v58 = vmul.f32 %v308_v21, %v267_v48  ;;  %v328_v59 = vmul.f32 %v303_v22, %v264_v49  ;;  %v329_v60 = vmul.f32 %v303_v22, %v265_v50 }
  0xc8   : > { %v318_v27 = vpop.permute.xlu1 %317  ;;  %v313_v28 = vpop.permute.xlu0 %312 }
  0xc9   : > { %v334_v7 = vmul.f32 %v318_v27, %v270_v61  ;;  %v335_v8 = vmul.f32 %v318_v27, %v271_v62  ;;  %v332_v9 = vmul.f32 %v313_v28, %v268_v63  ;;  %v333_v10 = vmul.f32 %v313_v28, %v269_v0 }
  0xcc   : > { %v352_v37 = vpop.permute.xlu1 %351  ;;  %v347_v38 = vpop.permute.xlu0 %346 }
  0xcd   : > { %v386_v39 = vadd.f32 %v352_v37, %v322_v32  ;;  %v387_v40 = vadd.f32 %v352_v37, %v323_v33  ;;  %v384_v41 = vadd.f32 %v347_v38, %v320_v30  ;;  %v385_v42 = vadd.f32 %v347_v38, %v321_v31 }
  0xcf   : > { %402 = vst [vmem:[%s964_s23 + $0x10] sm:$0xff] %v386_v39  ;;  %403 = vst [vmem:[%s964_s23 + $0x18] sm:$0xff] %v387_v40 }
  0xd0   : > { %400 = vst [vmem:[%s964_s23] sm:$0xff] %v384_v41  ;;  %401 = vst [vmem:[%s964_s23 + $0x8] sm:$0xff] %v385_v42  ;;  %v362_v51 = vpop.permute.xlu1 %361  ;;  %v357_v52 = vpop.permute.xlu0 %356 }
  0xd1   : > { %v390_v53 = vadd.f32 %v362_v51, %v326_v45  ;;  %v391_v54 = vadd.f32 %v362_v51, %v327_v46  ;;  %v388_v55 = vadd.f32 %v357_v52, %v324_v43  ;;  %v389_v56 = vadd.f32 %v357_v52, %v325_v44 }
  0xd3   : > { %406 = vst [vmem:[%s964_s23 + $0x30] sm:$0xff] %v390_v53  ;;  %407 = vst [vmem:[%s964_s23 + $0x38] sm:$0xff] %v391_v54 }
  0xd4   : > { %404 = vst [vmem:[%s964_s23 + $0x20] sm:$0xff] %v388_v55  ;;  %405 = vst [vmem:[%s964_s23 + $0x28] sm:$0xff] %v389_v56  ;;  %v372_v1 = vpop.permute.xlu1 %371  ;;  %v367_v2 = vpop.permute.xlu0 %366 }
  0xd5   : > { %v394_v3 = vadd.f32 %v372_v1, %v330_v57  ;;  %v395_v4 = vadd.f32 %v372_v1, %v331_v58  ;;  %v392_v5 = vadd.f32 %v367_v2, %v328_v59  ;;  %v393_v6 = vadd.f32 %v367_v2, %v329_v60 }
  0xd7   : > { %410 = vst [vmem:[%s964_s23 + $0x50] sm:$0xff] %v394_v3  ;;  %411 = vst [vmem:[%s964_s23 + $0x58] sm:$0xff] %v395_v4 }
  0xd8   : > { %408 = vst [vmem:[%s964_s23 + $0x40] sm:$0xff] %v392_v5  ;;  %409 = vst [vmem:[%s964_s23 + $0x48] sm:$0xff] %v393_v6  ;;  %v382_v11 = vpop.permute.xlu1 %381  ;;  %v377_v12 = vpop.permute.xlu0 %376 }
  0xd9   : > { %v398_v13 = vadd.f32 %v382_v11, %v334_v7  ;;  %v399_v14 = vadd.f32 %v382_v11, %v335_v8  ;;  %v396_v15 = vadd.f32 %v377_v12, %v332_v9  ;;  %v397_v16 = vadd.f32 %v377_v12, %v333_v10 }
  0xdb   : > { %414 = vst [vmem:[%s964_s23 + $0x70] sm:$0xff] %v398_v13  ;;  %415 = vst [vmem:[%s964_s23 + $0x78] sm:$0xff] %v399_v14 }
  0xdc   : > { %412 = vst [vmem:[%s964_s23 + $0x60] sm:$0xff] %v396_v15  ;;  %413 = vst [vmem:[%s964_s23 + $0x68] sm:$0xff] %v397_v16 }
  0xdd   : > { %683 = shalt.err (!%p680_p3)
}
  0xde   : > { %s684_s11 = scalar_lea.hbm %s990_s29, 2048  ;;  %s688_s8 = scalar_lea.hbm %s1048_s3, 4096 }
  0xdf   : > { %p685_p4 = scmp.ne.s32.totalorder %s990_s29, %s684_s11  ;;  %p689_p12 = scmp.lt.u32.totalorder %s990_s29, %s1048_s3 }
  0xe0   : > { %p690_p2 = scmp.lt.u32.totalorder %s688_s8, %s684_s11  ;;  %p692_p8 = scmp.lt.u32.totalorder %s684_s11, %s990_s29 }
  0xe1   : > { %p686_p6 = pnand %p685_p4, %p1055_p9 }
  0xe2   : > { %p691_p5 = por %p690_p2, %p689_p12 }
  0xe3   : > { %p687_p7 = pneg %p686_p6 }
  0xe4   : > { %p693_p11 = por %p692_p8, %p691_p5 }
  0xe6   : > { %p694_p0 = pnand %p693_p11, %p687_p7 }
  0xe8   : > { %697 = shalt.err (!%p694_p0)
}
  0xe9   : > { %s760_s23 = smov 256   ;;  %s761_s19 = smov 512  }
  0xea   : > { %s762_s22 = smov 16  }
  0xeb   : > { %571 = dma.vmem_to_hbm [thread:$0]  (%p1055_p9), %s992_s28, 2048, %s990_s29, %s417_s24, %s760_s23, %s761_s19, %s762_s22  }
  0xec PF: > { %s448_s15 = sand.u32 1, %s732_s12   ;;  %p1056_p10 = scmp.ne.s32.totalorder %s1053_s27, 0 }
  0xed   : > { %p1057_p13 = scmp.ge.s32.totalorder %s752_s17, 2  ;;  %s449_s30 = scalar_lea.sflag [#allocation4], %s448_s15 }
  0xef   : > { %p578_p1 = pnand %p1057_p13, %p1056_p10 }
  0xf1   : > { %727 = dma.done.wait (!%p578_p1), %s449_s30, 2048  }
  0xf2   : > { %729 = vsyncadd (!%p578_p1), %s449_s30, 4294965248  ;;  %s19_s17 = sadd.s32 1, %s752_s17   ;;  %s1058_s12 = smov %s736_s13 }
  0xf3   : > { %p16_p3 = scmp.ge.s32.totalorder %s19_s17, 4   ;;  %s1059_s13 = smov %s740_s14 }
  0xf4   : > { %s1060_s14 = smov %s839_s26  ;;  %s1061_s15 = smov %s748_s16 }
  0xf5   : > { %s1062_s16 = smov %s1064_s20  ;;  %18 = sbr.rel (!%p16_p3) target bundleno = 6 (0x6), region = 83 }
  0xfc   :  { %454 = vsyncpa [#allocation3], 1 }
  0xfd   :  { %456 = vsyncpa [#allocation3 + $0x1], 1 }
  0xfe   :  { %457 = vsyncpa [#allocation4], 1 }
  0xff   :  { %459 = vsyncpa [#allocation4 + $0x1], 1 }

</bundles_post_ra>
